<compile_context>
chip_gen: v7x
topology: tpu7x:2x2x1
jax: 0.10.0
libtpu: 0.0.40
codegen_flags: <defaults>
</compile_context>

<pallas_src>
import functools

import jax
import jax.numpy as jnp
from jax import lax
from jax.experimental import pallas as pl
from jax.experimental.pallas import tpu as pltpu


def _round_up(v, m):
    return ((v + m - 1) // m) * m


def _device_plan():
    """Generation-aware (num_parallel, VMEM budget/limit) plan."""
    kind = ""
    try:
        dev = jax.devices()[0]
        if dev.platform == "tpu":
            kind = str(dev.device_kind).lower()
    except Exception:
        kind = ""
    if "v7" in kind or "7x" in kind:
        # v7x: 2 TensorCores/chip, 64 MiB physical VMEM per TC -> keep the
        # resident plan well under that and shard the batch across both TCs.
        return dict(num_parallel=2, vmem_budget_bytes=40 << 20,
                    vmem_limit_bytes=48 << 20)
    if ("lite" in kind) or ("v5e" in kind) or ("v6" in kind):
        # v5e / v6e: single TensorCore, 128 MiB VMEM, small scoped default.
        return dict(num_parallel=1, vmem_budget_bytes=64 << 20,
                    vmem_limit_bytes=80 << 20)
    if ("v4" in kind) or ("v5" in kind):
        # v4 / v5p: megacore (2 TCs), 128 MiB VMEM.
        return dict(num_parallel=2, vmem_budget_bytes=64 << 20,
                    vmem_limit_bytes=80 << 20)
    if kind:
        # Unknown TPU generation: be conservative but still explicit.
        return dict(num_parallel=1, vmem_budget_bytes=32 << 20,
                    vmem_limit_bytes=48 << 20)
    # Non-TPU / no device info: safe defaults, no explicit limit.
    return dict(num_parallel=1, vmem_budget_bytes=16 << 20,
                vmem_limit_bytes=None)


def _choose_tile_b(batch, feat_dim, num_classes, x_itemsize, c_itemsize,
                   max_tile_b=2048, vmem_budget_bytes=64 << 20):
    """Pick the largest batch tile whose double-buffered x tiles plus live
    (TB, C) f32 intermediates fit the generation-specific VMEM budget."""
    c_pad = max(num_classes, 128)
    # Fixed residents: centers (double-buffered), (1,C) cc_s (double-buffered),
    # output tile(s), scratch, slack.
    fixed = (2 * num_classes * feat_dim * c_itemsize
             + 2 * c_pad * 4
             + 2 * 8 * 128 * 4
             + (1 << 16))
    # Per batch row: 2x x tile buffers, 2x label buffers, ~6 live (TB, C) f32
    # intermediates (xc, logits, e, select, ...), a few (TB, 1) f32 temps.
    per_row = (2 * feat_dim * x_itemsize
               + 2 * 4
               + 6 * c_pad * 4
               + 8 * 4)
    cap = max(8, (vmem_budget_bytes - fixed) // max(per_row, 1))
    tb = min(max_tile_b, cap, _round_up(batch, 8))
    return max(8, (tb // 8) * 8)


def _dual_classwise_kernel(x_ref, labels_ref, cs_ref, ccs_ref, o_ref,
                           acc_sc, *,
                           sigma, num_classes, batch_size, tile_b,
                           tiles_per_p):
    p = pl.program_id(0)          # parallel (core) axis
    i = pl.program_id(1)          # batch-tile (reduction) axis

    C = num_classes
    TB = tile_b

    # ---- init per-core accumulator at the start of each core's sweep ----
    @pl.when(i == 0)
    def _init():
        acc_sc[...] = jnp.zeros_like(acc_sc)

    x = x_ref[...]                                           # (TB, D)
    xf = x.astype(jnp.float32)
    labels = labels_ref[...]                                 # (TB, 1) int32

    # -0.5*sigma*||x||^2 per row (the only remaining per-tile scaling).
    xx_s = jnp.sum(xf * xf, axis=1, keepdims=True) * (-0.5 * sigma)  # (TB,1)

    # MXU: x . (sigma*centers)^T  -> already sigma * <x, c>.
    xc_s = lax.dot_general(x, cs_ref[...],
                           dimension_numbers=(((1,), (1,)), ((), ())),
                           preferred_element_type=jnp.float32)       # (TB,C)

    # e = exp(-0.5*sigma*distmat) = exp(xc_s + xx_s + cc_s)
    logits = xc_s + xx_s + ccs_ref[...]                              # (TB,C)
    e = jnp.exp(logits)

    denom = jnp.sum(e, axis=1, keepdims=True)                        # (TB,1)
    cls_iota = lax.broadcasted_iota(jnp.int32, (TB, C), 1)
    num = jnp.sum(jnp.where(labels == cls_iota, e, 0.0),
                  axis=1, keepdims=True)                             # (TB,1)
    # Same algebra as log(dist_div + 1e-6) at the label column.
    row_loss = jnp.log(num / (denom + 1e-6) + 1e-6)                  # (TB,1)

    # Mask padded rows (global row index >= true batch size).
    row_iota = lax.broadcasted_iota(jnp.int32, (TB, 1), 0)
    global_row = (p * tiles_per_p + i) * TB + row_iota
    valid = (global_row < batch_size).astype(jnp.float32)
    acc_sc[...] = acc_sc[...] + jnp.sum(row_loss * valid, keepdims=True)

    # ---- finalize: only on the last reduction step of this core ----
    @pl.when(i == tiles_per_p - 1)
    def _finalize():
        partial = -acc_sc[...] * (1.0 / float(batch_size))           # (1,1)
        o_ref[...] = jnp.broadcast_to(partial, (8, 128))             # lane-dense


def dual_classwise_loss(x, labels, centers, *, sigma=0.25, inner_param=0.1,
                        tile_b=None, num_parallel=None,
                        vmem_limit_bytes=None, matmul_dtype=None):
    """x: (B, D); labels: (B,) int; centers: (C, D). Returns scalar f32 loss."""
    B, D = x.shape
    C, _ = centers.shape

    plan = _device_plan()
    if num_parallel is None:
        num_parallel = plan["num_parallel"]
    if vmem_limit_bytes is None:
        vmem_limit_bytes = plan["vmem_limit_bytes"]

    # -------- batch-independent inter-center term: plain XLA, outside kernel
    cf = centers.astype(jnp.float32)
    c_norm = cf / jnp.maximum(
        jnp.sqrt(jnp.sum(cf * cf, axis=1, keepdims=True)), 1e-12)
    theta = 0.5 * float(D) * (c_norm @ c_norm.T)                     # (C, C)
    theta = jnp.where(jnp.eye(C, dtype=bool), 0.0, theta)
    # Log(t) = log(1 + exp(-|t|)) + max(t, 0)   (stable softplus)
    log_t = jnp.log(1.0 + jnp.exp(-jnp.abs(theta))) + jnp.maximum(theta, 0.0)
    loss_inner = jnp.sum(log_t) / float(C * (C - 1))

    # -------- precomputed centers-side inputs for the kernel
    # Optional reduced-precision matmul stream (halves x HBM traffic); keeps
    # default semantics (None -> use x's own dtype).
    mm_dtype = jnp.dtype(matmul_dtype) if matmul_dtype is not None else x.dtype
    c_scaled = (float(sigma) * cf).astype(mm_dtype)                  # (C, D)
    cc_s = ((-0.5 * float(sigma))
            * jnp.sum(cf * cf, axis=1)).reshape(1, C).astype(jnp.float32)
    x_mm = x.astype(mm_dtype) if mm_dtype != x.dtype else x

    if tile_b is None:
        tile_b = _choose_tile_b(B, D, C,
                                x_itemsize=jnp.dtype(mm_dtype).itemsize,
                                c_itemsize=jnp.dtype(mm_dtype).itemsize,
                                vmem_budget_bytes=plan["vmem_budget_bytes"])
    # TODO(synk): tile centers over an extra grid axis when C*D is too large
    # to keep the (C, D) block VMEM-resident (e.g. C ~ 100k classes).

    labels2d = labels.reshape(B, 1).astype(jnp.int32)

    tiles = pl.cdiv(B, tile_b)
    num_parallel = max(1, min(int(num_parallel), tiles))
    tiles_per_p = pl.cdiv(tiles, num_parallel)
    total_tiles = tiles_per_p * num_parallel
    b_pad = total_tiles * tile_b
    if b_pad != B:
        x_mm = jnp.pad(x_mm, ((0, b_pad - B), (0, 0)))
        labels2d = jnp.pad(labels2d, ((0, b_pad - B), (0, 0)),
                           constant_values=-1)   # never matches a class

    kernel = functools.partial(
        _dual_classwise_kernel,
        sigma=float(sigma),
        num_classes=C,
        batch_size=B,                 # true batch for normalization/masking
        tile_b=tile_b,
        tiles_per_p=tiles_per_p,
    )

    cost = pl.CostEstimate(
        flops=2 * b_pad * C * D + 8 * b_pad * C,
        transcendentals=b_pad * C + b_pad,
        bytes_accessed=(b_pad * D * x_mm.dtype.itemsize
                        + C * D * c_scaled.dtype.itemsize
                        + C * 4 + b_pad * 4
                        + num_parallel * 8 * 128 * 4),
    )

    cp_kwargs = dict(dimension_semantics=("parallel", "arbitrary"))
    if vmem_limit_bytes is not None:
        cp_kwargs["vmem_limit_bytes"] = int(vmem_limit_bytes)

    out = pl.pallas_call(
        kernel,
        out_shape=jax.ShapeDtypeStruct((num_parallel * 8, 128), jnp.float32),
        grid_spec=pltpu.PrefetchScalarGridSpec(
            num_scalar_prefetch=0,
            grid=(num_parallel, tiles_per_p),
            in_specs=[
                # x tile: auto double-buffered by the pipeline
                pl.BlockSpec((tile_b, D), lambda p, i: (p * tiles_per_p + i, 0)),
                # labels tile
                pl.BlockSpec((tile_b, 1), lambda p, i: (p * tiles_per_p + i, 0)),
                # sigma-scaled centers: VMEM-resident across the whole grid
                pl.BlockSpec((C, D), lambda p, i: (0, 0)),
                # -0.5*sigma*||c||^2 row: VMEM-resident
                pl.BlockSpec((1, C), lambda p, i: (0, 0)),
            ],
            # one lane-dense (8,128) partial-result tile per parallel slice
            out_specs=pl.BlockSpec((8, 128), lambda p, i: (p, 0)),
            scratch_shapes=[
                pltpu.VMEM((1, 1), jnp.float32),   # cross-entropy accumulator
            ],
        ),
        compiler_params=pltpu.CompilerParams(**cp_kwargs),
        cost_estimate=cost,
    )(x_mm, labels2d, c_scaled, cc_s)

    partials = out.reshape(num_parallel, 8, 128)[:, 0, 0]
    return jnp.sum(partials) + float(inner_param) * loss_inner


if __name__ == "__main__":
    # Deterministic small example consistent with (batch, feat_dim) inputs.
    num_classes = 8
    feat_dim = 32
    batch = 8
    sigma = 0.25
    inner_param = 0.1

    key = jax.random.PRNGKey(0)
    kx, kc, kl = jax.random.split(key, 3)
    x = jax.random.normal(kx, (batch, feat_dim), dtype=jnp.float32)
    # Deterministic "randn" init of the centers parameter (module __init__).
    centers = jax.random.normal(kc, (num_classes, feat_dim), dtype=jnp.float32)
    labels = jax.random.randint(kl, (batch,), 0, num_classes, dtype=jnp.int32)

    loss = dual_classwise_loss(x, labels, centers,
                               sigma=sigma, inner_param=inner_param)
    jax.block_until_ready(loss)

    # Lightweight sanity check against a pure-JAX reference of the module.
    def ref(x, labels, centers):
        xx = jnp.sum(x * x, axis=1, keepdims=True)
        cc = jnp.sum(centers * centers, axis=1, keepdims=True)
        distmat = xx + cc.T - 2.0 * x @ centers.T
        e = jnp.exp(-0.5 * sigma * distmat)
        dist_div = e / (jnp.sum(e, axis=1, keepdims=True) + 1e-6)
        mask = (labels[:, None] == jnp.arange(num_classes)[None, :]).astype(jnp.float32)
        loss = -jnp.sum(jnp.log(dist_div + 1e-6) * mask) / batch
        cn = centers / jnp.maximum(
            jnp.sqrt(jnp.sum(centers * centers, axis=1, keepdims=True)), 1e-12)
        theta = 0.5 * feat_dim * cn @ cn.T
        theta = jnp.where(jnp.eye(num_classes, dtype=bool), 0.0, theta)
        lt = jnp.log(1.0 + jnp.exp(-jnp.abs(theta))) + jnp.maximum(theta, 0.0)
        loss_iner = jnp.sum(lt) / (num_classes * (num_classes - 1))
        return loss + inner_param * loss_iner

    r = ref(x, labels, centers)
    assert jnp.allclose(loss, r, rtol=1e-5, atol=1e-5), (loss, r)
    print("KERNEL_OK")
</pallas_src>

<mosaic_0001>
module attributes {stable_mosaic.version = 11 : i64} {
  func.func @_dual_classwise_kernel(%arg0: i32, %arg1: i32, %arg2: memref<8x32xf32, #tpu.memory_space<vmem>>, %arg3: memref<8x1xi32, #tpu.memory_space<vmem>>, %arg4: memref<8x32xf32, #tpu.memory_space<vmem>>, %arg5: memref<1x8xf32, #tpu.memory_space<vmem>>, %arg6: memref<8x128xf32, #tpu.memory_space<vmem>>, %arg7: memref<1x1xf32, #tpu.memory_space<vmem>>) attributes {dimension_semantics = [#tpu.dimension_semantics<parallel>, #tpu.dimension_semantics<arbitrary>], iteration_bounds = array<i64: 1, 1>, scalar_prefetch = 0 : i64, scratch_operands = 1 : i64, tpu.core_type = #tpu.core_type<tc>, window_params = [{transform_indices = @transform_0, window_bounds = array<i64: 8, 32>}, {transform_indices = @transform_1, window_bounds = array<i64: 8, 1>}, {pipeline_mode = #tpu.pipeline_mode<synchronous>, transform_indices = @transform_2, window_bounds = array<i64: 8, 32>}, {pipeline_mode = #tpu.pipeline_mode<synchronous>, transform_indices = @transform_3, window_bounds = array<i64: 1, 8>}, {transform_indices = @transform_4, window_bounds = array<i64: 8, 128>}]} {
    %c0_i32 = arith.constant 0 : i32
    %0 = arith.cmpi eq, %arg1, %c0_i32 : i32
    %1 = arith.extui %0 : i1 to i32
    %c0_i32_0 = arith.constant 0 : i32
    %2 = arith.cmpi ne, %1, %c0_i32_0 : i32
    scf.if %2 {
      %cst_23 = arith.constant 0.000000e+00 : f32
      %55 = vector.broadcast %cst_23 : f32 to vector<1x1xf32>
      %c0_24 = arith.constant 0 : index
      %c0_25 = arith.constant 0 : index
      %56 = vector.load %arg7[%c0_24, %c0_25] : memref<1x1xf32, #tpu.memory_space<vmem>>, vector<1x1xf32>
      tpu.vector_store %arg7[%c0_24, %c0_25], %55 {strides = array<i32>} : memref<1x1xf32, #tpu.memory_space<vmem>>, vector<1x1xf32>,
    } else {
    }
    %c0 = arith.constant 0 : index
    %c0_1 = arith.constant 0 : index
    %3 = vector.load %arg2[%c0, %c0_1] : memref<8x32xf32, #tpu.memory_space<vmem>>, vector<8x32xf32>
    %c0_2 = arith.constant 0 : index
    %c0_3 = arith.constant 0 : index
    %4 = vector.load %arg3[%c0_2, %c0_3] : memref<8x1xi32, #tpu.memory_space<vmem>>, vector<8x1xi32>
    %5 = arith.mulf %3, %3 : vector<8x32xf32>
    %cst = arith.constant dense<0.000000e+00> : vector<8xf32>
    %6 = vector.multi_reduction <add>, %5, %cst [1] : vector<8x32xf32> to vector<8xf32>
    %7 = vector.shape_cast %6 : vector<8xf32> to vector<8x1xf32>
    %cst_4 = arith.constant -1.250000e-01 : f32
    %8 = vector.broadcast %cst_4 : f32 to vector<8x1xf32>
    %9 = arith.mulf %7, %8 : vector<8x1xf32>
    %c0_5 = arith.constant 0 : index
    %c0_6 = arith.constant 0 : index
    %10 = vector.load %arg4[%c0_5, %c0_6] : memref<8x32xf32, #tpu.memory_space<vmem>>, vector<8x32xf32>
    %cst_7 = arith.constant dense<0.000000e+00> : vector<8x8xf32>
    %11 = tpu.matmul %3, %10, %cst_7 {dimension_numbers = #tpu.dot_dimension_numbers<[1], [1], [0], [0], [0, 0, 1, 0], [], []>} : vector<8x32xf32>, vector<8x32xf32>, vector<8x8xf32> -> vector<8x8xf32>
    %12 = vector.broadcast %9 : vector<8x1xf32> to vector<8x8xf32>
    %13 = arith.addf %11, %12 : vector<8x8xf32>
    %c0_8 = arith.constant 0 : index
    %c0_9 = arith.constant 0 : index
    %14 = vector.load %arg5[%c0_8, %c0_9] : memref<1x8xf32, #tpu.memory_space<vmem>>, vector<1x8xf32>
    %15 = vector.broadcast %14 : vector<1x8xf32> to vector<8x8xf32>
    %16 = arith.addf %13, %15 : vector<8x8xf32>
    %17 = math.exp %16 : vector<8x8xf32>
    %cst_10 = arith.constant dense<0.000000e+00> : vector<8xf32>
    %18 = vector.multi_reduction <add>, %17, %cst_10 [1] : vector<8x8xf32> to vector<8xf32>
    %19 = vector.shape_cast %18 : vector<8xf32> to vector<8x1xf32>
    %20 = tpu.iota {dimensions = array<i32: 1>} : vector<8x8xi32>
    %21 = vector.broadcast %4 : vector<8x1xi32> to vector<8x8xi32>
    %22 = arith.cmpi eq, %21, %20 : vector<8x8xi32>
    %cst_11 = arith.constant 0.000000e+00 : f32
    %23 = vector.broadcast %cst_11 : f32 to vector<8x8xf32>
    %24 = arith.select %22, %17, %23 : vector<8x8xi1>, vector<8x8xf32>
    %cst_12 = arith.constant dense<0.000000e+00> : vector<8xf32>
    %25 = vector.multi_reduction <add>, %24, %cst_12 [1] : vector<8x8xf32> to vector<8xf32>
    %26 = vector.shape_cast %25 : vector<8xf32> to vector<8x1xf32>
    %cst_13 = arith.constant 9.99999997E-7 : f32
    %27 = vector.broadcast %cst_13 : f32 to vector<8x1xf32>
    %28 = arith.addf %19, %27 : vector<8x1xf32>
    %29 = arith.divf %26, %28 : vector<8x1xf32>
    %cst_14 = arith.constant 9.99999997E-7 : f32
    %30 = vector.broadcast %cst_14 : f32 to vector<8x1xf32>
    %31 = arith.addf %29, %30 : vector<8x1xf32>
    %32 = math.log %31 : vector<8x1xf32>
    %33 = tpu.iota {dimensions = array<i32: 0>} : vector<8x1xi32>
    %c1_i32 = arith.constant 1 : i32
    %34 = arith.muli %arg0, %c1_i32 : i32
    %35 = arith.addi %34, %arg1 : i32
    %c8_i32 = arith.constant 8 : i32
    %36 = arith.muli %35, %c8_i32 : i32
    %37 = vector.broadcast %36 : i32 to vector<8x1xi32>
    %38 = arith.addi %37, %33 : vector<8x1xi32>
    %c8_i32_15 = arith.constant 8 : i32
    %39 = vector.broadcast %c8_i32_15 : i32 to vector<8x1xi32>
    %40 = arith.cmpi slt, %38, %39 : vector<8x1xi32>
    %41 = arith.extui %40 : vector<8x1xi1> to vector<8x1xi32>
    %42 = arith.sitofp %41 : vector<8x1xi32> to vector<8x1xf32>
    %c0_16 = arith.constant 0 : index
    %c0_17 = arith.constant 0 : index
    %43 = vector.load %arg7[%c0_16, %c0_17] : memref<1x1xf32, #tpu.memory_space<vmem>>, vector<1x1xf32>
    %44 = arith.mulf %32, %42 : vector<8x1xf32>
    %45 = vector.shape_cast %44 : vector<8x1xf32> to vector<1x8x1xf32>
    %cst_18 = arith.constant dense<0.000000e+00> : vector<1xf32>
    %46 = vector.multi_reduction <add>, %45, %cst_18 [1, 2] : vector<1x8x1xf32> to vector<1xf32>
    %47 = vector.shape_cast %46 : vector<1xf32> to vector<1x1x1xf32>
    %48 = vector.extract %47[0, 0, 0] : f32 from vector<1x1x1xf32>
    %49 = vector.broadcast %48 : f32 to vector<1x1xf32>
    %50 = arith.addf %43, %49 : vector<1x1xf32>
    %c0_19 = arith.constant 0 : index
    %c0_20 = arith.constant 0 : index
    %51 = vector.load %arg7[%c0_19, %c0_20] : memref<1x1xf32, #tpu.memory_space<vmem>>, vector<1x1xf32>
    tpu.vector_store %arg7[%c0_19, %c0_20], %50 {strides = array<i32>} : memref<1x1xf32, #tpu.memory_space<vmem>>, vector<1x1xf32>,
    %c0_i32_21 = arith.constant 0 : i32
    %52 = arith.cmpi eq, %arg1, %c0_i32_21 : i32
    %53 = arith.extui %52 : i1 to i32
    %c0_i32_22 = arith.constant 0 : i32
    %54 = arith.cmpi ne, %53, %c0_i32_22 : i32
    scf.if %54 {
      %c0_23 = arith.constant 0 : index
      %c0_24 = arith.constant 0 : index
      %55 = vector.load %arg7[%c0_23, %c0_24] : memref<1x1xf32, #tpu.memory_space<vmem>>, vector<1x1xf32>
      %cst_25 = arith.constant 0.000000e+00 : f32
      %56 = vector.broadcast %cst_25 : f32 to vector<1x1xf32>
      %57 = arith.subf %56, %55 : vector<1x1xf32>
      %cst_26 = arith.constant 1.250000e-01 : f32
      %58 = vector.broadcast %cst_26 : f32 to vector<1x1xf32>
      %59 = arith.mulf %57, %58 : vector<1x1xf32>
      %60 = vector.shape_cast %59 : vector<1x1xf32> to vector<1x1xf32>
      %61 = vector.broadcast %60 : vector<1x1xf32> to vector<8x128xf32>
      %c0_27 = arith.constant 0 : index
      %c0_28 = arith.constant 0 : index
      %62 = vector.load %arg6[%c0_27, %c0_28] : memref<8x128xf32, #tpu.memory_space<vmem>>, vector<8x128xf32>
      tpu.vector_store %arg6[%c0_27, %c0_28], %61 {strides = array<i32>} : memref<8x128xf32, #tpu.memory_space<vmem>>, vector<8x128xf32>,
    } else {
    }
    return
  }
  func.func @transform_0(%arg0: i32, %arg1: i32) -> (i32, i32) {
    %c1_i32 = arith.constant 1 : i32
    %0 = arith.muli %arg0, %c1_i32 : i32
    %1 = arith.addi %0, %arg1 : i32
    %c0_i32 = arith.constant 0 : i32
    %c0_i32_0 = arith.constant 0 : i32
    return %1, %c0_i32 : i32, i32
  }
  func.func @transform_1(%arg0: i32, %arg1: i32) -> (i32, i32) {
    %c1_i32 = arith.constant 1 : i32
    %0 = arith.muli %arg0, %c1_i32 : i32
    %1 = arith.addi %0, %arg1 : i32
    %c0_i32 = arith.constant 0 : i32
    %c0_i32_0 = arith.constant 0 : i32
    return %1, %c0_i32 : i32, i32
  }
  func.func @transform_2(%arg0: i32, %arg1: i32) -> (i32, i32) {
    %c0_i32 = arith.constant 0 : i32
    %c0_i32_0 = arith.constant 0 : i32
    %c0_i32_1 = arith.constant 0 : i32
    return %c0_i32, %c0_i32_0 : i32, i32
  }
  func.func @transform_3(%arg0: i32, %arg1: i32) -> (i32, i32) {
    %c0_i32 = arith.constant 0 : i32
    %c0_i32_0 = arith.constant 0 : i32
    %c0_i32_1 = arith.constant 0 : i32
    return %c0_i32, %c0_i32_0 : i32, i32
  }
  func.func @transform_4(%arg0: i32, %arg1: i32) -> (i32, i32) {
    %c0_i32 = arith.constant 0 : i32
    %c0_i32_0 = arith.constant 0 : i32
    return %arg0, %c0_i32 : i32, i32
  }
}

</mosaic_0001>

<bundles_post_ra>
// kernel: tpu_custom_call.1
= control target key start
LH: loop header
LB: loop body
LE: loop exit
PB: predicated region body
PF: predicated region fallthrough
CT: control target
= control target key end

     0   :  { %vm56_vm0 = vcmask 0   ;;  %vm61_vm1 = vcmask 261120   ;;  %v289_v2 = vmov 0.0   ;;  %vm290_vm2 = vmmov 0   ;;  %s347_s0 = inlined_call_operand.vmem [shape: f32[8,32], index: 0, kind: input, shape index: {}]   ;;  %s348_s1 = inlined_call_operand.vmem [shape: s32[8,1], index: 1, kind: input, shape index: {}]   ;;  %s349_s2 = inlined_call_operand.vmem [shape: f32[8,32], index: 2, kind: input, shape index: {}]   ;;  %s350_s3 = inlined_call_operand.vmem [shape: f32[1,8], index: 3, kind: input, shape index: {}]   ;;  %s351_s4 = inlined_call_operand.hbm [shape: f32[8,128], index: 4, kind: output, shape index: {}]  }
   0x1   :  { %v66_v0 = vld [vmem:[%s349_s2] sm:$0xff]  ;;  %57 = vst.msk [vmem:[#allocation2] sm:$0x1] %vm56_vm0, %v289_v2  ;;  %246 = vmatprep.subr.mxu0 %v289_v2  ;;  %248 = vmatprep.mubr.msk.f32.mxu0 %vm290_vm2, %v289_v2 }
   0x2   :  { %v58_v1 = vld [vmem:[%s347_s0] sm:$0xff] }
   0x3   :  { %v60_v3 = vmul.f32 %v58_v1, %v58_v1 }
   0x4   :  { %9 = vsyncpa [#allocation4], 0  ;;  %247 = vmatpush3.xpose.msk.msra.mxu0 %vm61_vm1, %v66_v0  ;;  %v291_v4 = vmov 0   ;;  %v59_v6 = vld [vmem:[%s348_s1] sm:$0xff]  ;;  %v157_v15 = vlaneseq  ;;  %vm153_vm3 = vcmask 64512   ;;  %vm184_vm5 = vcmask 7168  }
   0x5   :  { %257 = vset.pattern.permute.xlu0 %v291_v4  ;;  %v62_v5 = vsel %vm61_vm1, %v60_v3, 0.0  ;;  %258 = vset.pattern.permute.xlu1 %v291_v4  ;;  %v243_v10 = vld [vmem:[%s350_s3] ss:$0 sm:$0xff]  ;;  %s292_s3 = smov [#allocation3]  }
   0x6   :  { %63 = vadd.xlane.f32.xlu0 %v62_v5  ;;  %v158_v16 = vand.u32 127, %v157_v15  ;;  %v207_v41 = vshrl.u32 %v157_v15, 7  ;;  %s221_s21 = sshll.u32 %s292_s3, 4  ;;  %s222_s21 = int_to_ptr.vmem [resolvable:$true] %s221_s21 }
   0x7   :  { %249 = vmatmul.mubr.msk.f32.vlgmr.msra.gmra.mrb[0].mxu0 %vm61_vm1, %v58_v1  ;;  %s265_s22 = scalar_lea.vmem %s222_s21, 128  ;;  %p270_p1 = scmp.lt.s32.totalorder %s222_s21, %s222_s21 }
   0x8   :  { %v182_v38 = vld [vmem:[#allocation2] sm:$0x1]  ;;  %v208_v44 = vsub.s32 0, %v207_v41  ;;  %p266_p0 = scmp.ne.s32.totalorder %s222_s21, %s265_s22  ;;  %p271_p2 = scmp.lt.s32.totalorder %s265_s22, %s265_s22 }
   0xa   :  { %p272_p3 = por %p271_p2, %p270_p1 }
   0xc   :  { %p273_p4 = pnand %p272_p3, %p266_p0 }
  0x1c   :  { %160 = vperm.xlu0 %257, %v59_v6  }
  0x93   :  { %v64_v7 = vpop.xlane.xlu0 %63 }
  0x94   :  { %v65_v8 = vmul.f32 -0.125, %v64_v7 }
  0x9b   :  { %v161_v17 = vpop.permute.xlu0 %160 }
  0x9c   :  { %vm162_vm4 = vcmp.eq.s32.totalorder %v161_v17, %v158_v16 }
  0xda   :  { %v139_v9 = vpop.f32.mrb[0].mxu0 }
  0xdb   :  { %v140_v11 = vadd.f32 %v139_v9, %v65_v8  ;;  %v250_v12 = vpop.f32.mrb[1].mxu0 }
  0xdd   :  { %v150_v13 = vadd.f32 %v243_v10, %v140_v11 }
  0xdf   :  { %v151_v14 = vmul.f32 1.442695, %v150_v13 }
  0xe1   :  { %259 = vpow2.f32 %v151_v14 }
  0xeb   :  { %v260_v18 = vpop.eup %259 }
  0xec   :  { %v154_v19 = vsel %vm153_vm3, %v260_v18, 0.0  ;;  %v163_v20 = vsel %vm162_vm4, %v260_v18, 0.0 }
  0xed   :  { %155 = vadd.xlane.f32.xlu1 %v154_v19  ;;  %v164_v21 = vsel %vm153_vm3, %v163_v20, 0.0 }
  0xf1   :  { %165 = vadd.xlane.f32.xlu1 %v164_v21 }
 0x17a   :  { %v156_v22 = vpop.xlane.xlu1 %155 }
 0x17b   :  { %v167_v23 = vadd.f32 1e-06, %v156_v22 }
 0x17d   :  { %261 = vrcp.f32 %v167_v23 }
 0x17e   :  { %v166_v25 = vpop.xlane.xlu1 %165 }
 0x187   :  { %v262_v24 = vpop.eup %261 }
 0x188   :  { %v169_v26 = vmul.f32 %v262_v24, %v166_v25 }
 0x18a   :  { %v170_v27 = vadd.f32 1e-06, %v169_v26 }
 0x18c   :  { %263 = vlog2.f32 %v170_v27 }
 0x196   :  { %v264_v28 = vpop.eup %263 }
 0x197   :  { %v172_v29 = vmul.f32 0.6931472, %v264_v28 }
 0x199   :  { %v185_v30 = vsel %vm184_vm5, %v172_v29, 0.0 }
 0x19a   :  { %186 = vadd.xlane.f32.xlu1 %v185_v30 }
 0x227   :  { %v187_v31 = vpop.xlane.xlu1 %186 }
 0x228   :  { %v188_v32 = vrot.slane %v187_v31, 4 }
 0x22a   :  { %v189_v33 = vadd.f32 %v188_v32, %v187_v31 }
 0x22c   :  { %v190_v34 = vrot.slane %v189_v33, 2 }
 0x22e   :  { %v191_v35 = vadd.f32 %v190_v34, %v189_v33 }
 0x230   :  { %v192_v36 = vrot.slane %v191_v35, 1 }
 0x232   :  { %v193_v37 = vadd.f32 %v192_v36, %v191_v35 }
 0x234   :  { %251 = vpush %v193_v37 }
 0x265   :  { %s252_s1 = spop %251 }
 0x266   :  { %v195_v39 = vstv %s252_s1 }
 0x267   :  { %v196_v40 = vadd.f32 %v195_v39, %v182_v38 }
 0x269   :  { %198 = vst.msk [vmem:[#allocation2] sm:$0x1] %vm56_vm0, %v196_v40 }
 0x270   :  { %v202_v42 = vld [vmem:[#allocation2] sm:$0x1] }
 0x271   :  { %v203_v43 = vsub.f32 0.0, %v202_v42 }
 0x273   :  { %v204_v45 = vmul.f32 0.125, %v203_v43 }
 0x275   :  { %v209_v46 = vrot.slane %v204_v45, %v208_v44 }
 0x277   :  { %211 = vperm.xlu1 %258, %v209_v46  }
 0x2f6   :  { %v212_v47 = vpop.permute.xlu1 %211 }
 0x2f7   :  { %214 = vst [vmem:[#allocation3] sm:$0xff] %v212_v47 }
 0x2f8   :  { %276 = shalt.err (!%p273_p4)
}
 0x2f9   :  { %s277_s25 = scalar_lea.hbm %s351_s4, 128 }
 0x2fa   :  { %p278_p5 = scmp.ne.s32.totalorder %s351_s4, %s277_s25  ;;  %p281_p6 = scmp.lt.u32.totalorder %s277_s25, %s351_s4 }
 0x2fc   :  { %p283_p7 = pnand %p281_p6, %p278_p5 }
 0x2fe   :  { %286 = shalt.err (!%p283_p7)
}
 0x2ff   :  { %224 = dma.vmem_to_hbm [thread:$0]  %s222_s21, 128, %s351_s4, [#allocation4]  }
 0x300   :  { %287 = dma.done.wait [#allocation4], 128  }
 0x301   :  { %288 = vsyncadd [#allocation4], 4294967168 }
 0x302   :  { %228 = vsyncpa [#allocation4], 1 }

</bundles_post_ra>
